<compile_context>
chip_gen: v6e
topology: v6e:2x2x1
jax: 0.10.0
libtpu: 0.0.40
codegen_flags: <defaults>
</compile_context>

<pallas_src>
import functools

import jax
import jax.numpy as jnp
from jax.experimental import pallas as pl
from jax.experimental.pallas import tpu as pltpu

BN_EPS = 1e-5


def _round_up(n, m):
    return ((n + m - 1) // m) * m


def fcnet_kernel(x_ref, w_ref, vec_ref, o_ref, *, in_len, h1p, h2p, cp):
    """x_ref: [B, in_len] f32; w_ref: stacked padded weights; vec_ref: [1, P] f32."""
    mxu_dtype = w_ref.dtype
    x = x_ref[...].astype(mxu_dtype)            # in-kernel cast: 1 VPU pack, free

    # Static sublane-axis slices into the stacked weight slab.  Row offsets
    # (in_len, in_len + h1p) are multiples of 16 -> no tile-boundary copies.
    w1 = w_ref[pl.ds(0, in_len), pl.ds(0, h1p)]
    w2 = w_ref[pl.ds(in_len, h1p), pl.ds(0, h2p)]
    w3 = w_ref[pl.ds(in_len + h1p, h2p), pl.ds(0, cp)]

    # Static, 128-lane-aligned slices into the packed per-feature vector.
    g1 = vec_ref[:, pl.ds(0, h1p)]
    be1 = vec_ref[:, pl.ds(h1p, h1p)]
    g2 = vec_ref[:, pl.ds(2 * h1p, h2p)]
    be2 = vec_ref[:, pl.ds(2 * h1p + h2p, h2p)]
    b3 = vec_ref[:, pl.ds(2 * h1p + 2 * h2p, cp)]

    def bn_relu(h, g, be):
        # Train-mode BatchNorm folded to one FMA.  Single-pass biased variance,
        # clamped at 0 so rsqrt never sees a negative from f32 cancellation.
        mu = jnp.mean(h, axis=0, keepdims=True)
        var = jnp.maximum(jnp.mean(h * h, axis=0, keepdims=True) - mu * mu, 0.0)
        scale = g * jax.lax.rsqrt(var + BN_EPS)       # EUP rsqrt: free slot
        shift = be - mu * scale
        return jnp.maximum(h * scale + shift, 0.0).astype(mxu_dtype)

    # fc1 / fc2 biases omitted: a per-feature constant shift is exactly removed
    # by the batch-mean subtraction of training-mode BatchNorm.
    h = jnp.dot(x, w1, preferred_element_type=jnp.float32)
    h = bn_relu(h, g1, be1)
    h = jnp.dot(h, w2, preferred_element_type=jnp.float32)
    h = bn_relu(h, g2, be2)
    # Lane-dense [B, cp] store (cp is a multiple of 128 -> unmasked vst).
    o_ref[...] = (jnp.dot(h, w3, preferred_element_type=jnp.float32)
                  + b3).astype(o_ref.dtype)


def pack_params(params, mxu_dtype=jnp.bfloat16):
    """Pad to lane-dense widths, drop BN-cancelled biases, pack weights + vectors."""
    (w1, b1, g1, be1, w2, b2, g2, be2, w3, b3) = params
    del b1, b2  # exactly cancelled by training-mode BatchNorm mean subtraction

    in_len, h1 = w1.shape
    h2 = w2.shape[1]
    c = w3.shape[1]
    h1p = _round_up(h1, 128)
    h2p = _round_up(h2, 128)
    cp = _round_up(c, 128)
    wp = max(h1p, h2p, cp)
    # Keep stacked-row offsets sublane-clean for bf16 (16-row granule).
    assert in_len % 16 == 0 and h1p % 16 == 0, "stack row offsets must be x16"

    def pad2(a, rows, cols):
        return jnp.pad(a, ((0, rows - a.shape[0]), (0, cols - a.shape[1])))

    # One stacked weight slab: rows [0:in_len]=w1, [in_len:in_len+h1p]=w2, rest=w3.
    w_stack = jnp.concatenate(
        [pad2(w1, in_len, wp), pad2(w2, h1p, wp), pad2(w3, h2p, wp)],
        axis=0).astype(mxu_dtype)

    # One packed per-feature vector: [g1 | be1 | g2 | be2 | b3].
    vec = jnp.concatenate(
        [pad2(g1, 1, h1p), pad2(be1, 1, h1p),
         pad2(g2, 1, h2p), pad2(be2, 1, h2p),
         pad2(b3, 1, cp)], axis=1).astype(jnp.float32)

    return w_stack, vec, (in_len, h1p, h2p, cp)


def fcnet_forward(x, w_stack, vec, *, dims, num_classes):
    """x: [B, in_len] f32 -> logits [B, num_classes] f32.

    Intended to be called under the caller's jit so the trailing slice fuses.
    """
    in_len, h1p, h2p, cp = dims
    B = x.shape[0]

    kernel = functools.partial(fcnet_kernel, in_len=in_len, h1p=h1p, h2p=h2p, cp=cp)
    vmem = pl.BlockSpec(memory_space=pltpu.MemorySpace.VMEM)

    flops = 2 * B * (in_len * h1p + h1p * h2p + h2p * cp)
    bytes_accessed = (x.size * x.dtype.itemsize
                      + w_stack.size * w_stack.dtype.itemsize
                      + vec.size * 4 + B * cp * 4)

    out = pl.pallas_call(
        kernel,
        out_shape=jax.ShapeDtypeStruct((B, cp), jnp.float32),
        in_specs=[vmem, vmem, vmem],
        out_specs=vmem,
        cost_estimate=pl.CostEstimate(flops=flops,
                                      transcendentals=h1p + h2p,
                                      bytes_accessed=bytes_accessed),
    )(x, w_stack, vec)

    return out[:, :num_classes]


def init_params(key, in_len, hidden_1, hidden_2, num_classes):
    """Deterministic synthetic init (PyTorch-style fan_in bounds); weights as [in, out]."""
    ks = jax.random.split(key, 6)

    def linear(kw, kb, fan_in, fan_out):
        bound = 1.0 / jnp.sqrt(fan_in)
        w = jax.random.uniform(kw, (fan_in, fan_out), jnp.float32, -bound, bound)
        b = jax.random.uniform(kb, (1, fan_out), jnp.float32, -bound, bound)
        return w, b

    w1, b1 = linear(ks[0], ks[1], in_len, hidden_1)
    w2, b2 = linear(ks[2], ks[3], hidden_1, hidden_2)
    w3, b3 = linear(ks[4], ks[5], hidden_2, num_classes)
    g1 = jnp.ones((1, hidden_1), jnp.float32)
    be1 = jnp.zeros((1, hidden_1), jnp.float32)
    g2 = jnp.ones((1, hidden_2), jnp.float32)
    be2 = jnp.zeros((1, hidden_2), jnp.float32)
    return (w1, b1, g1, be1, w2, b2, g2, be2, w3, b3)


def fcnet_reference(x, params, mxu_dtype=jnp.float32):
    """Pure-JAX reference matching the PyTorch module (BatchNorm1d in training mode).

    mxu_dtype controls matmul input precision only (mirrors the kernel's bf16
    MXU feeding); BN / ReLU math is always f32.
    """
    (w1, b1, g1, be1, w2, b2, g2, be2, w3, b3) = params

    def mm(a, w):
        return jnp.dot(a.astype(mxu_dtype), w.astype(mxu_dtype),
                       preferred_element_type=jnp.float32)

    def bn(h, g, be):
        mu = jnp.mean(h, axis=0, keepdims=True)
        var = jnp.mean((h - mu) ** 2, axis=0, keepdims=True)   # biased, train-mode
        return (h - mu) / jnp.sqrt(var + BN_EPS) * g + be

    h = jnp.maximum(bn(mm(x, w1) + b1, g1, be1), 0.0)
    h = jnp.maximum(bn(mm(h, w2) + b2, g2, be2), 0.0)
    return mm(h, w3) + b3
    # TODO(synk): BatchNorm running-stat (momentum) updates are a training-time
    # side effect of the PyTorch module, not part of the forward output; omitted.


if __name__ == "__main__":
    # Small shapes consistent with the module's forward (in_len shrunk from 4000).
    B, in_len, hidden_1, hidden_2, num_classes = 8, 256, 64, 128, 2

    key = jax.random.PRNGKey(0)
    k_x, k_p = jax.random.split(key)
    x = jax.random.normal(k_x, (B, in_len), jnp.float32)
    params = init_params(k_p, in_len, hidden_1, hidden_2, num_classes)

    # ---- f32 MXU validation path: tight check against the f32 reference ----
    w_s32, vec32, dims32 = pack_params(params, jnp.float32)
    fwd32 = jax.jit(functools.partial(fcnet_forward, dims=dims32,
                                      num_classes=num_classes))
    out_f32 = jax.block_until_ready(fwd32(x, w_s32, vec32))
    ref_f32 = fcnet_reference(x, params, jnp.float32)
    assert out_f32.shape == (B, num_classes)
    assert jnp.allclose(out_f32, ref_f32, atol=1e-4, rtol=1e-4)

    # ---- bf16 MXU deployment path (v5e/v6e/v7x) ----
    w_sbf, vecbf, dimsbf = pack_params(params, jnp.bfloat16)
    fwd_bf = jax.jit(functools.partial(fcnet_forward, dims=dimsbf,
                                       num_classes=num_classes))
    out_bf16 = jax.block_until_ready(fwd_bf(x, w_sbf, vecbf))
    ref_bf16 = fcnet_reference(x, params, jnp.bfloat16)
    assert out_bf16.shape == (B, num_classes)
    assert jnp.allclose(out_bf16, ref_bf16, atol=2e-2, rtol=2e-2)
    # Loose sanity check against the full-f32 reference.
    assert jnp.allclose(out_bf16, ref_f32, atol=1e-1, rtol=1e-1)

    print("KERNEL_OK")
</pallas_src>

<mosaic_0001>
module attributes {stable_mosaic.version = 11 : i64} {
  func.func @fcnet_kernel(%arg0: memref<8x256xf32, #tpu.memory_space<vmem>>, %arg1: memref<512x128xf32, #tpu.memory_space<vmem>>, %arg2: memref<1x640xf32, #tpu.memory_space<vmem>>, %arg3: memref<8x128xf32, #tpu.memory_space<vmem>>) attributes {dimension_semantics = [], scalar_prefetch = 0 : i64, scratch_operands = 0 : i64, tpu.core_type = #tpu.core_type<tc>} {
    %c0 = arith.constant 0 : index
    %c0_0 = arith.constant 0 : index
    %0 = vector.load %arg0[%c0, %c0_0] : memref<8x256xf32, #tpu.memory_space<vmem>>, vector<8x256xf32>
    %c0_1 = arith.constant 0 : index
    %c0_2 = arith.constant 0 : index
    %1 = vector.load %arg1[%c0_1, %c0_2] : memref<512x128xf32, #tpu.memory_space<vmem>>, vector<256x128xf32>
    %c256 = arith.constant 256 : index
    %c0_3 = arith.constant 0 : index
    %2 = vector.load %arg1[%c256, %c0_3] : memref<512x128xf32, #tpu.memory_space<vmem>>, vector<128x128xf32>
    %c384 = arith.constant 384 : index
    %c0_4 = arith.constant 0 : index
    %3 = vector.load %arg1[%c384, %c0_4] : memref<512x128xf32, #tpu.memory_space<vmem>>, vector<128x128xf32>
    %c0_5 = arith.constant 0 : index
    %c0_6 = arith.constant 0 : index
    %4 = vector.load %arg2[%c0_5, %c0_6] : memref<1x640xf32, #tpu.memory_space<vmem>>, vector<1x128xf32>
    %c0_7 = arith.constant 0 : index
    %c128 = arith.constant 128 : index
    %5 = vector.load %arg2[%c0_7, %c128] : memref<1x640xf32, #tpu.memory_space<vmem>>, vector<1x128xf32>
    %c0_8 = arith.constant 0 : index
    %c256_9 = arith.constant 256 : index
    %6 = vector.load %arg2[%c0_8, %c256_9] : memref<1x640xf32, #tpu.memory_space<vmem>>, vector<1x128xf32>
    %c0_10 = arith.constant 0 : index
    %c384_11 = arith.constant 384 : index
    %7 = vector.load %arg2[%c0_10, %c384_11] : memref<1x640xf32, #tpu.memory_space<vmem>>, vector<1x128xf32>
    %c0_12 = arith.constant 0 : index
    %c512 = arith.constant 512 : index
    %8 = vector.load %arg2[%c0_12, %c512] : memref<1x640xf32, #tpu.memory_space<vmem>>, vector<1x128xf32>
    %cst = arith.constant dense<0.000000e+00> : vector<8x128xf32>
    %9 = tpu.matmul %0, %1, %cst {dimension_numbers = #tpu.dot_dimension_numbers<[1], [0], [0], [1], [0, 0, 1, 1], [], []>} : vector<8x256xf32>, vector<256x128xf32>, vector<8x128xf32> -> vector<8x128xf32>
    %cst_13 = arith.constant dense<0.000000e+00> : vector<128xf32>
    %10 = vector.multi_reduction <add>, %9, %cst_13 [0] : vector<8x128xf32> to vector<128xf32>
    %11 = vector.shape_cast %10 : vector<128xf32> to vector<1x128xf32>
    %cst_14 = arith.constant 8.000000e+00 : f32
    %12 = vector.broadcast %cst_14 : f32 to vector<1x128xf32>
    %13 = arith.divf %11, %12 : vector<1x128xf32>
    %14 = arith.mulf %9, %9 : vector<8x128xf32>
    %cst_15 = arith.constant dense<0.000000e+00> : vector<128xf32>
    %15 = vector.multi_reduction <add>, %14, %cst_15 [0] : vector<8x128xf32> to vector<128xf32>
    %16 = vector.shape_cast %15 : vector<128xf32> to vector<1x128xf32>
    %cst_16 = arith.constant 8.000000e+00 : f32
    %17 = vector.broadcast %cst_16 : f32 to vector<1x128xf32>
    %18 = arith.divf %16, %17 : vector<1x128xf32>
    %19 = arith.mulf %13, %13 : vector<1x128xf32>
    %20 = arith.subf %18, %19 : vector<1x128xf32>
    %cst_17 = arith.constant 0.000000e+00 : f32
    %21 = vector.broadcast %cst_17 : f32 to vector<1x128xf32>
    %22 = arith.maximumf %20, %21 : vector<1x128xf32>
    %cst_18 = arith.constant 9.99999974E-6 : f32
    %23 = vector.broadcast %cst_18 : f32 to vector<1x128xf32>
    %24 = arith.addf %22, %23 : vector<1x128xf32>
    %25 = math.rsqrt %24 : vector<1x128xf32>
    %26 = arith.mulf %4, %25 : vector<1x128xf32>
    %27 = arith.mulf %13, %26 : vector<1x128xf32>
    %28 = arith.subf %5, %27 : vector<1x128xf32>
    %29 = vector.broadcast %26 : vector<1x128xf32> to vector<8x128xf32>
    %30 = arith.mulf %9, %29 : vector<8x128xf32>
    %31 = vector.broadcast %28 : vector<1x128xf32> to vector<8x128xf32>
    %32 = arith.addf %30, %31 : vector<8x128xf32>
    %cst_19 = arith.constant 0.000000e+00 : f32
    %33 = vector.broadcast %cst_19 : f32 to vector<8x128xf32>
    %34 = arith.maximumf %32, %33 : vector<8x128xf32>
    %cst_20 = arith.constant dense<0.000000e+00> : vector<8x128xf32>
    %35 = tpu.matmul %34, %2, %cst_20 {dimension_numbers = #tpu.dot_dimension_numbers<[1], [0], [0], [1], [0, 0, 1, 1], [], []>} : vector<8x128xf32>, vector<128x128xf32>, vector<8x128xf32> -> vector<8x128xf32>
    %cst_21 = arith.constant dense<0.000000e+00> : vector<128xf32>
    %36 = vector.multi_reduction <add>, %35, %cst_21 [0] : vector<8x128xf32> to vector<128xf32>
    %37 = vector.shape_cast %36 : vector<128xf32> to vector<1x128xf32>
    %cst_22 = arith.constant 8.000000e+00 : f32
    %38 = vector.broadcast %cst_22 : f32 to vector<1x128xf32>
    %39 = arith.divf %37, %38 : vector<1x128xf32>
    %40 = arith.mulf %35, %35 : vector<8x128xf32>
    %cst_23 = arith.constant dense<0.000000e+00> : vector<128xf32>
    %41 = vector.multi_reduction <add>, %40, %cst_23 [0] : vector<8x128xf32> to vector<128xf32>
    %42 = vector.shape_cast %41 : vector<128xf32> to vector<1x128xf32>
    %cst_24 = arith.constant 8.000000e+00 : f32
    %43 = vector.broadcast %cst_24 : f32 to vector<1x128xf32>
    %44 = arith.divf %42, %43 : vector<1x128xf32>
    %45 = arith.mulf %39, %39 : vector<1x128xf32>
    %46 = arith.subf %44, %45 : vector<1x128xf32>
    %cst_25 = arith.constant 0.000000e+00 : f32
    %47 = vector.broadcast %cst_25 : f32 to vector<1x128xf32>
    %48 = arith.maximumf %46, %47 : vector<1x128xf32>
    %cst_26 = arith.constant 9.99999974E-6 : f32
    %49 = vector.broadcast %cst_26 : f32 to vector<1x128xf32>
    %50 = arith.addf %48, %49 : vector<1x128xf32>
    %51 = math.rsqrt %50 : vector<1x128xf32>
    %52 = arith.mulf %6, %51 : vector<1x128xf32>
    %53 = arith.mulf %39, %52 : vector<1x128xf32>
    %54 = arith.subf %7, %53 : vector<1x128xf32>
    %55 = vector.broadcast %52 : vector<1x128xf32> to vector<8x128xf32>
    %56 = arith.mulf %35, %55 : vector<8x128xf32>
    %57 = vector.broadcast %54 : vector<1x128xf32> to vector<8x128xf32>
    %58 = arith.addf %56, %57 : vector<8x128xf32>
    %cst_27 = arith.constant 0.000000e+00 : f32
    %59 = vector.broadcast %cst_27 : f32 to vector<8x128xf32>
    %60 = arith.maximumf %58, %59 : vector<8x128xf32>
    %cst_28 = arith.constant dense<0.000000e+00> : vector<8x128xf32>
    %61 = tpu.matmul %60, %3, %cst_28 {dimension_numbers = #tpu.dot_dimension_numbers<[1], [0], [0], [1], [0, 0, 1, 1], [], []>} : vector<8x128xf32>, vector<128x128xf32>, vector<8x128xf32> -> vector<8x128xf32>
    %62 = vector.broadcast %8 : vector<1x128xf32> to vector<8x128xf32>
    %63 = arith.addf %61, %62 : vector<8x128xf32>
    %c0_29 = arith.constant 0 : index
    %c0_30 = arith.constant 0 : index
    %64 = vector.load %arg3[%c0_29, %c0_30] : memref<8x128xf32, #tpu.memory_space<vmem>>, vector<8x128xf32>
    tpu.vector_store %arg3[%c0_29, %c0_30], %63 {strides = array<i32>} : memref<8x128xf32, #tpu.memory_space<vmem>>, vector<8x128xf32>,
    return
  }
}

</mosaic_0001>

<bundles_post_ra>
// kernel: fcnet_forward.1
= control target key start
LH: loop header
LB: loop body
LE: loop exit
PB: predicated region body
PF: predicated region fallthrough
CT: control target
= control target key end

     0   :  { %8 = vsyncpa [#allocation3], 0  ;;  %s716_s0 = inlined_call_operand.hbm [shape: f32[8,256], index: 0, kind: input, shape index: {}]   ;;  %s717_s1 = inlined_call_operand.hbm [shape: f32[512,128], index: 1, kind: input, shape index: {}]   ;;  %s718_s2 = inlined_call_operand.hbm [shape: f32[1,640], index: 2, kind: input, shape index: {}]   ;;  %s719_s3 = inlined_call_operand.vmem [shape: f32[8,128], index: 3, kind: output, shape index: {}]  }
   0x1   :  { %9 = vsyncpa [#allocation5], 0  ;;  %s637_s12 = smov [#allocation4]  }
   0x2   :  { %s25_s13 = sshll.u32 %s637_s12, 4  ;;  %s26_s13 = int_to_ptr.vmem [resolvable:$true] %s25_s13 }
   0x3   :  { %s581_s14 = scalar_lea.vmem %s26_s13, 8192  ;;  %p586_p1 = scmp.lt.s32.totalorder %s26_s13, %s26_s13 }
   0x4   :  { %p582_p0 = scmp.ne.s32.totalorder %s26_s13, %s581_s14  ;;  %p587_p2 = scmp.lt.s32.totalorder %s581_s14, %s581_s14 }
   0x6   :  { %p588_p3 = por %p587_p2, %p586_p1 }
   0x8   :  { %p589_p4 = pnand %p588_p3, %p582_p0 }
   0xa   :  { %592 = shalt.err (!%p589_p4)
}
   0xb   :  { %s638_s15 = smov 128   ;;  %s639_s16 = smov 8  }
   0xc   :  { %31 = dma.hbm_to_vmem [thread:$0]  %s717_s1, 8192, %s26_s13, [#allocation5], %s638_s15, %s638_s15, %s639_s16  }
   0xd   :  { %s640_s19 = smov [#allocation2]   ;;  %s641_s21 = smov [#allocation6]  }
   0xe   :  { %s16_s20 = sshll.u32 %s640_s19, 4  ;;  %s38_s22 = sshll.u32 %s641_s21, 4  ;;  %s17_s20 = int_to_ptr.vmem [resolvable:$true] %s16_s20  ;;  %s39_s22 = int_to_ptr.vmem [resolvable:$true] %s38_s22 }
   0xf   :  { %s601_s23 = scalar_lea.vmem %s17_s20, 256  ;;  %p606_p6 = scmp.lt.s32.totalorder %s17_s20, %s17_s20 }
  0x10   :  { %p602_p5 = scmp.ne.s32.totalorder %s17_s20, %s601_s23  ;;  %p607_p7 = scmp.lt.s32.totalorder %s601_s23, %s601_s23 }
  0x12   :  { %p608_p8 = por %p607_p7, %p606_p6 }
  0x14   :  { %p609_p9 = pnand %p608_p8, %p602_p5 }
  0x16   :  { %612 = shalt.err (!%p609_p9)
}
  0x17   :  { %19 = dma.hbm_to_vmem [thread:$0]  %s716_s0, 256, %s17_s20, [#allocation3]  }
  0x18   :  { %s621_s26 = scalar_lea.vmem %s39_s22, 80  ;;  %s625_s1 = scalar_lea.vmem %s39_s22, 96 }
  0x19   :  { %p622_p10 = scmp.ne.s32.totalorder %s39_s22, %s621_s26  ;;  %p626_p11 = scmp.lt.s32.totalorder %s39_s22, %s39_s22 }
  0x1a   :  { %p627_p12 = scmp.lt.s32.totalorder %s625_s1, %s621_s26 }
  0x1c   :  { %p628_p13 = por %p627_p12, %p626_p11 }
  0x1e   :  { %p629_p0 = pnand %p628_p13, %p622_p10 }
  0x20   :  { %632 = shalt.err (!%p629_p0)
}
  0x21   :  { %41 = dma.hbm_to_vmem [thread:$0]  %s718_s2, 80, %s39_s22, [#allocation5]  }
  0x22   :  { %633 = dma.done.wait [#allocation3], 256  }
  0x23   :  { %634 = vsyncadd [#allocation3], 4294967040 }
  0x24   :  { %635 = dma.done.wait [#allocation5], 8272  }
  0x25   :  { %636 = vsyncadd [#allocation5], 4294959024  ;;  %v84_v0 = vld [vmem:[#allocation4 + $0xf8] sm:$0xff]  ;;  %v83_v2 = vld [vmem:[#allocation4 + $0xf0] sm:$0xff]  ;;  %v642_v35 = vmov 0.0   ;;  %vm643_vm0 = vmmov 0  }
  0x26   :  { %v68_v1 = vld [vmem:[#allocation4 + $0x78] sm:$0xff]  ;;  %423 = vmatprep.subr.mxu0 %v84_v0  ;;  %v67_v3 = vld [vmem:[#allocation4 + $0x70] sm:$0xff]  ;;  %v82_v4 = vld [vmem:[#allocation4 + $0xe8] sm:$0xff]  ;;  %492 = vmatprep.subr.mxu1 %v642_v35 }
  0x27   :  { %424 = vmatpush3.msra.mxu0 %v68_v1  ;;  %v66_v5 = vld [vmem:[#allocation4 + $0x68] sm:$0xff]  ;;  %v81_v6 = vld [vmem:[#allocation4 + $0xe0] sm:$0xff]  ;;  %v80_v8 = vld [vmem:[#allocation4 + $0xd8] sm:$0xff]  ;;  %524 = vmatprep.mubr.msk.f32.mxu1 %vm643_vm0, %v642_v35 }
  0x28   :  { %425 = vmatprep.subr.mxu0 %v83_v2  ;;  %v65_v7 = vld [vmem:[#allocation4 + $0x60] sm:$0xff]  ;;  %v64_v9 = vld [vmem:[#allocation4 + $0x58] sm:$0xff]  ;;  %v79_v10 = vld [vmem:[#allocation4 + $0xd0] sm:$0xff] }
  0x29   :  { %426 = vmatpush3.msra.mxu0 %v67_v3  ;;  %v63_v11 = vld [vmem:[#allocation4 + $0x50] sm:$0xff]  ;;  %v78_v12 = vld [vmem:[#allocation4 + $0xc8] sm:$0xff]  ;;  %v52_v13 = vld [vmem:[#allocation2 + $0x8] sm:$0xff] }
  0x2a   :  { %427 = vmatprep.subr.mxu0 %v82_v4  ;;  %v62_v14 = vld [vmem:[#allocation4 + $0x48] sm:$0xff]  ;;  %186 = vmatprep.mubr.f32.mxu0 %v52_v13  ;;  %v77_v15 = vld [vmem:[#allocation4 + $0xc0] sm:$0xff]  ;;  %v76_v17 = vld [vmem:[#allocation4 + $0xb8] sm:$0xff] }
  0x2b   :  { %428 = vmatpush3.msra.mxu0 %v66_v5  ;;  %v61_v16 = vld [vmem:[#allocation4 + $0x40] sm:$0xff]  ;;  %v60_v18 = vld [vmem:[#allocation4 + $0x38] sm:$0xff]  ;;  %v75_v19 = vld [vmem:[#allocation4 + $0xb0] sm:$0xff] }
  0x2c   :  { %429 = vmatprep.subr.mxu0 %v81_v6  ;;  %v59_v20 = vld [vmem:[#allocation4 + $0x30] sm:$0xff]  ;;  %v74_v21 = vld [vmem:[#allocation4 + $0xa8] sm:$0xff]  ;;  %v73_v23 = vld [vmem:[#allocation4 + $0xa0] sm:$0xff] }
  0x2d   :  { %430 = vmatpush3.msra.mxu0 %v65_v7  ;;  %v58_v22 = vld [vmem:[#allocation4 + $0x28] sm:$0xff]  ;;  %v57_v24 = vld [vmem:[#allocation4 + $0x20] sm:$0xff]  ;;  %v72_v25 = vld [vmem:[#allocation4 + $0x98] sm:$0xff] }
  0x2e   :  { %431 = vmatprep.subr.mxu0 %v80_v8  ;;  %v56_v26 = vld [vmem:[#allocation4 + $0x18] sm:$0xff]  ;;  %v71_v27 = vld [vmem:[#allocation4 + $0x90] sm:$0xff]  ;;  %v70_v29 = vld [vmem:[#allocation4 + $0x88] sm:$0xff] }
  0x2f   :  { %432 = vmatpush3.msra.mxu0 %v64_v9  ;;  %v55_v28 = vld [vmem:[#allocation4 + $0x10] sm:$0xff]  ;;  %v54_v30 = vld [vmem:[#allocation4 + $0x8] sm:$0xff]  ;;  %v69_v31 = vld [vmem:[#allocation4 + $0x80] sm:$0xff]  ;;  %v217_v9 = vlaneseq }
  0x30   :  { %433 = vmatprep.subr.mxu0 %v79_v10  ;;  %v53_v32 = vld [vmem:[#allocation4] sm:$0xff]  ;;  %v51_v33 = vld [vmem:[#allocation2] sm:$0xff]  ;;  %v100_v34 = vld [vmem:[#allocation4 + $0x178] sm:$0xff] }
  0x31   :  { %434 = vmatpush3.msra.mxu0 %v63_v11  ;;  %v99_v36 = vld [vmem:[#allocation4 + $0x170] sm:$0xff]  ;;  %493 = vmatpush3.msra.mxu1 %v100_v34  ;;  %v98_v37 = vld [vmem:[#allocation4 + $0x168] sm:$0xff]  ;;  %v97_v38 = vld [vmem:[#allocation4 + $0x160] sm:$0xff]  ;;  %v218_v10 = vshrl.u32 %v217_v9, 7 }
  0x32   :  { %435 = vmatprep.subr.mxu0 %v78_v12  ;;  %494 = vmatprep.subr.mxu1 %v642_v35  ;;  %v96_v39 = vld [vmem:[#allocation4 + $0x158] sm:$0xff]  ;;  %v95_v40 = vld [vmem:[#allocation4 + $0x150] sm:$0xff]  ;;  %v94_v41 = vld [vmem:[#allocation4 + $0x148] sm:$0xff] }
  0x33   :  { %436 = vmatpush3.msra.mxu0 %v62_v14  ;;  %495 = vmatpush3.msra.mxu1 %v99_v36  ;;  %v93_v42 = vld [vmem:[#allocation4 + $0x140] sm:$0xff]  ;;  %v92_v43 = vld [vmem:[#allocation4 + $0x138] sm:$0xff]  ;;  %v91_v44 = vld [vmem:[#allocation4 + $0x130] sm:$0xff]  ;;  %v692_v12 = vsub.s32 0, %v218_v10 }
  0x34   :  { %437 = vmatprep.subr.mxu0 %v77_v15  ;;  %496 = vmatprep.subr.mxu1 %v642_v35  ;;  %v90_v45 = vld [vmem:[#allocation4 + $0x128] sm:$0xff]  ;;  %v89_v46 = vld [vmem:[#allocation4 + $0x120] sm:$0xff]  ;;  %v88_v47 = vld [vmem:[#allocation4 + $0x118] sm:$0xff] }
  0x35   :  { %438 = vmatpush3.msra.mxu0 %v61_v16  ;;  %497 = vmatpush3.msra.mxu1 %v98_v37  ;;  %v87_v48 = vld [vmem:[#allocation4 + $0x110] sm:$0xff]  ;;  %v86_v49 = vld [vmem:[#allocation4 + $0x108] sm:$0xff]  ;;  %v85_v50 = vld [vmem:[#allocation4 + $0x100] sm:$0xff] }
  0x36   :  { %439 = vmatprep.subr.mxu0 %v76_v17  ;;  %498 = vmatprep.subr.mxu1 %v642_v35  ;;  %v117_v11 = vld [vmem:[#allocation6] sm:$0x1]  ;;  %v118_v15 = vld [vmem:[#allocation6 + $0x1] sm:$0x1]  ;;  %v104_v36 = vld [vmem:[#allocation4 + $0x198] sm:$0xff] }
  0x37   :  { %440 = vmatpush3.msra.mxu0 %v60_v18  ;;  %499 = vmatpush3.msra.mxu1 %v97_v38  ;;  %v105_v34 = vld [vmem:[#allocation4 + $0x1a0] sm:$0xff]  ;;  %v103_v37 = vld [vmem:[#allocation4 + $0x190] sm:$0xff]  ;;  %v102_v38 = vld [vmem:[#allocation4 + $0x188] sm:$0xff] }
  0x38   :  { %441 = vmatprep.subr.mxu0 %v75_v19  ;;  %500 = vmatprep.subr.mxu1 %v642_v35 }
  0x39   :  { %442 = vmatpush3.msra.mxu0 %v59_v20  ;;  %501 = vmatpush3.msra.mxu1 %v96_v39  ;;  %v101_v39 = vld [vmem:[#allocation4 + $0x180] sm:$0xff] }
  0x3a   :  { %443 = vmatprep.subr.mxu0 %v74_v21  ;;  %502 = vmatprep.subr.mxu1 %v642_v35 }
  0x3b   :  { %444 = vmatpush3.msra.mxu0 %v58_v22  ;;  %503 = vmatpush3.msra.mxu1 %v95_v40 }
  0x3c   :  { %445 = vmatprep.subr.mxu0 %v73_v23  ;;  %504 = vmatprep.subr.mxu1 %v642_v35  ;;  %v116_v23 = vld [vmem:[#allocation4 + $0x1f8] sm:$0xff] }
  0x3d   :  { %446 = vmatpush3.msra.mxu0 %v57_v24  ;;  %505 = vmatpush3.msra.mxu1 %v94_v41  ;;  %v115_v24 = vld [vmem:[#allocation4 + $0x1f0] sm:$0xff] }
  0x3e   :  { %447 = vmatprep.subr.mxu0 %v72_v25  ;;  %506 = vmatprep.subr.mxu1 %v642_v35  ;;  %v114_v25 = vld [vmem:[#allocation4 + $0x1e8] sm:$0xff] }
  0x3f   :  { %448 = vmatpush3.msra.mxu0 %v56_v26  ;;  %507 = vmatpush3.msra.mxu1 %v93_v42  ;;  %v113_v26 = vld [vmem:[#allocation4 + $0x1e0] sm:$0xff] }
  0x40   :  { %449 = vmatprep.subr.mxu0 %v71_v27  ;;  %508 = vmatprep.subr.mxu1 %v642_v35  ;;  %v112_v27 = vld [vmem:[#allocation4 + $0x1d8] sm:$0xff] }
  0x41   :  { %450 = vmatpush3.msra.mxu0 %v55_v28  ;;  %509 = vmatpush3.msra.mxu1 %v92_v43  ;;  %v111_v28 = vld [vmem:[#allocation4 + $0x1d0] sm:$0xff] }
  0x42   :  { %451 = vmatprep.subr.mxu0 %v70_v29  ;;  %510 = vmatprep.subr.mxu1 %v642_v35  ;;  %v110_v29 = vld [vmem:[#allocation4 + $0x1c8] sm:$0xff] }
  0x43   :  { %452 = vmatpush3.msra.mxu0 %v54_v30  ;;  %511 = vmatpush3.msra.mxu1 %v91_v44  ;;  %v109_v30 = vld [vmem:[#allocation4 + $0x1c0] sm:$0xff] }
  0x44   :  { %453 = vmatprep.subr.mxu0 %v69_v31  ;;  %512 = vmatprep.subr.mxu1 %v642_v35  ;;  %v108_v31 = vld [vmem:[#allocation4 + $0x1b8] sm:$0xff] }
  0x45   :  { %454 = vmatpush3.msra.mxu0 %v53_v32  ;;  %513 = vmatpush3.msra.mxu1 %v90_v45  ;;  %v107_v32 = vld [vmem:[#allocation4 + $0x1b0] sm:$0xff] }
  0x46   :  { %187 = vmatmul.mubr.f32.vlgmr.msra.gmra.mxu0 %v51_v33  ;;  %527 = vmatprep.subr.mxu0 %v642_v35  ;;  %v106_v33 = vld [vmem:[#allocation4 + $0x1a8] sm:$0xff] }
  0x47   :  { %559 = vmatprep.mubr.msk.f32.mxu0 %vm643_vm0, %v642_v35  ;;  %514 = vmatprep.subr.mxu1 %v642_v35 }
  0x48   :  { %515 = vmatpush3.msra.mxu1 %v89_v46  ;;  %528 = vmatpush3.msra.mxu0 %v116_v23 }
  0x49   :  { %516 = vmatprep.subr.mxu1 %v642_v35  ;;  %529 = vmatprep.subr.mxu0 %v642_v35 }
  0x4a   :  { %517 = vmatpush3.msra.mxu1 %v88_v47  ;;  %530 = vmatpush3.msra.mxu0 %v115_v24 }
  0x4b   :  { %518 = vmatprep.subr.mxu1 %v642_v35  ;;  %531 = vmatprep.subr.mxu0 %v642_v35 }
  0x4c   :  { %519 = vmatpush3.msra.mxu1 %v87_v48  ;;  %532 = vmatpush3.msra.mxu0 %v114_v25 }
  0x4d   :  { %520 = vmatprep.subr.mxu1 %v642_v35  ;;  %533 = vmatprep.subr.mxu0 %v642_v35 }
  0x4e   :  { %521 = vmatpush3.msra.mxu1 %v86_v49  ;;  %534 = vmatpush3.msra.mxu0 %v113_v26 }
  0x4f   :  { %522 = vmatprep.subr.mxu1 %v642_v35  ;;  %535 = vmatprep.subr.mxu0 %v642_v35 }
  0x50   :  { %523 = vmatpush3.msra.mxu1 %v85_v50  ;;  %536 = vmatpush3.msra.mxu0 %v112_v27 }
  0x51   :  { %537 = vmatprep.subr.mxu0 %v642_v35 }
  0x52   :  { %538 = vmatpush3.msra.mxu0 %v111_v28 }
  0x53   :  { %539 = vmatprep.subr.mxu0 %v642_v35 }
  0x54   :  { %540 = vmatpush3.msra.mxu0 %v110_v29 }
  0x55   :  { %541 = vmatprep.subr.mxu0 %v642_v35 }
  0x56   :  { %542 = vmatpush3.msra.mxu0 %v109_v30 }
  0x57   :  { %543 = vmatprep.subr.mxu0 %v642_v35 }
  0x58   :  { %544 = vmatpush3.msra.mxu0 %v108_v31 }
  0x59   :  { %545 = vmatprep.subr.mxu0 %v642_v35 }
  0x5a   :  { %546 = vmatpush3.msra.mxu0 %v107_v32 }
  0x5b   :  { %547 = vmatprep.subr.mxu0 %v642_v35 }
  0x5c   :  { %548 = vmatpush3.msra.mxu0 %v106_v33 }
  0x5d   :  { %549 = vmatprep.subr.mxu0 %v642_v35 }
  0x5e   :  { %550 = vmatpush3.msra.mxu0 %v105_v34 }
  0x5f   :  { %551 = vmatprep.subr.mxu0 %v642_v35 }
  0x60   :  { %552 = vmatpush3.msra.mxu0 %v104_v36 }
  0x61   :  { %553 = vmatprep.subr.mxu0 %v642_v35 }
  0x62   :  { %554 = vmatpush3.msra.mxu0 %v103_v37 }
  0x63   :  { %555 = vmatprep.subr.mxu0 %v642_v35 }
  0x64   :  { %556 = vmatpush3.msra.mxu0 %v102_v38 }
  0x65   :  { %557 = vmatprep.subr.mxu0 %v642_v35 }
  0x66   :  { %558 = vmatpush3.msra.mxu0 %v101_v39 }
 0x106   :  { %v455_v51 = vpop.f32.mrf.mxu0 }
 0x108   :  { %v456_v52 = vpop.f32.mrf.mxu0 }
 0x109   :  { %v457_v53 = vadd.f32 %v456_v52, %v455_v51 }
 0x10b   :  { %v192_v54 = vrot.slane %v457_v53, 4  ;;  %v200_v55 = vmul.f32 %v457_v53, %v457_v53 }
 0x10d   :  { %v193_v56 = vadd.f32 %v457_v53, %v192_v54  ;;  %v201_v57 = vrot.slane %v200_v55, 4 }
 0x10f   :  { %v194_v58 = vrot.slane %v193_v56, 2  ;;  %v202_v59 = vadd.f32 %v201_v57, %v200_v55 }
 0x111   :  { %v195_v60 = vadd.f32 %v194_v58, %v193_v56  ;;  %v203_v61 = vrot.slane %v202_v59, 2 }
 0x113   :  { %v196_v62 = vrot.slane %v195_v60, 1  ;;  %v204_v63 = vadd.f32 %v203_v61, %v202_v59 }
 0x115   :  { %v197_v0 = vadd.f32 %v196_v62, %v195_v60  ;;  %v205_v1 = vrot.slane %v204_v63, 1  ;;  %v119_v60 = vld [vmem:[#allocation6 + $0x2] sm:$0x1] }
 0x117   :  { %v206_v2 = vadd.f32 %v205_v1, %v204_v63  ;;  %v199_v3 = vmul.f32 0.125, %v197_v0  ;;  %v120_v63 = vld [vmem:[#allocation6 + $0x3] sm:$0x1] }
 0x119   :  { %v207_v4 = vmul.f32 0.125, %v206_v2  ;;  %v208_v5 = vmul.f32 %v199_v3, %v199_v3 }
 0x11b   :  { %v209_v6 = vsub.f32 %v207_v4, %v208_v5 }
 0x11d   :  { %v210_v7 = vmax.f32 %v209_v6, 0.0 }
 0x11f   :  { %v211_v8 = vadd.f32 1e-05, %v210_v7  ;;  %v422_v7 = vld [vmem:[#allocation6 + $0x4] ss:$0 sm:$0xff] }
 0x121   :  { %569 = vrsqrt.f32 %v211_v8 }
 0x12e   :  { %v570_v13 = vpop.eup %569 }
 0x12f   :  { %v213_v14 = vmul.f32 %v570_v13, %v117_v11 }
 0x131   :  { %v214_v16 = vmul.f32 %v213_v14, %v199_v3  ;;  %v220_v17 = vrot.slane %v213_v14, %v692_v12 }
 0x133   :  { %v215_v18 = vsub.f32 %v118_v15, %v214_v16  ;;  %v222_v19 = vmul.f32 %v457_v53, %v220_v17 }
 0x135   :  { %v227_v20 = vrot.slane %v215_v18, %v692_v12 }
 0x137   :  { %v229_v21 = vadd.f32 %v227_v20, %v222_v19 }
 0x139   :  { %v230_v22 = vmax.f32 %v229_v21, 0.0 }
 0x13b   :  { %525 = vmatmul.mubr.f32.vlgmr.msra.gmra.mxu1 %v230_v22 }
 0x1fb   :  { %v297_v40 = vpop.f32.mrf.mxu1 }
 0x1fc   :  { %v301_v41 = vrot.slane %v297_v40, 4  ;;  %v308_v42 = vmul.f32 %v297_v40, %v297_v40 }
 0x1fd   :  { %v526_v43 = vpop.f32.mrf.mxu1 }
 0x1fe   :  { %v302_v44 = vadd.f32 %v301_v41, %v297_v40  ;;  %v309_v45 = vrot.slane %v308_v42, 4 }
 0x200   :  { %v303_v46 = vrot.slane %v302_v44, 2  ;;  %v310_v47 = vadd.f32 %v309_v45, %v308_v42 }
 0x202   :  { %v304_v48 = vadd.f32 %v303_v46, %v302_v44  ;;  %v311_v49 = vrot.slane %v310_v47, 2 }
 0x204   :  { %v305_v50 = vrot.slane %v304_v48, 1  ;;  %v312_v51 = vadd.f32 %v311_v49, %v310_v47 }
 0x206   :  { %v306_v52 = vadd.f32 %v305_v50, %v304_v48  ;;  %v313_v53 = vrot.slane %v312_v51, 1 }
 0x208   :  { %v307_v54 = vmul.f32 0.125, %v306_v52  ;;  %v314_v55 = vadd.f32 %v313_v53, %v312_v51 }
 0x20a   :  { %v315_v56 = vmul.f32 0.125, %v314_v55  ;;  %v316_v57 = vmul.f32 %v307_v54, %v307_v54 }
 0x20c   :  { %v317_v35 = vsub.f32 %v315_v56, %v316_v57 }
 0x20e   :  { %v318_v58 = vmax.f32 %v317_v35, 0.0 }
 0x210   :  { %v319_v59 = vadd.f32 1e-05, %v318_v58 }
 0x212   :  { %571 = vrsqrt.f32 %v319_v59 }
 0x21f   :  { %v572_v61 = vpop.eup %571 }
 0x220   :  { %v321_v62 = vmul.f32 %v572_v61, %v119_v60 }
 0x222   :  { %v322_v0 = vmul.f32 %v321_v62, %v307_v54  ;;  %v328_v1 = vrot.slane %v321_v62, %v692_v12 }
 0x224   :  { %v323_v2 = vsub.f32 %v120_v63, %v322_v0  ;;  %v330_v3 = vmul.f32 %v328_v1, %v297_v40 }
 0x226   :  { %v335_v4 = vrot.slane %v323_v2, %v692_v12 }
 0x228   :  { %v337_v5 = vadd.f32 %v335_v4, %v330_v3 }
 0x22a   :  { %v338_v6 = vmax.f32 %v337_v5, 0.0 }
 0x22c   :  { %560 = vmatmul.mubr.f32.vlgmr.msra.gmra.mxu0 %v338_v6 }
 0x2ec   :  { %v411_v8 = vpop.f32.mrf.mxu0 }
 0x2ed   :  { %v412_v9 = vadd.f32 %v422_v7, %v411_v8 }
 0x2ee   :  { %v561_v10 = vpop.f32.mrf.mxu0 }
 0x2ef   :  { %415 = vst [vmem:[%s719_s3] sm:$0xff] %v412_v9 }
 0x2f0   :  { %420 = vsyncpa [#allocation3], 1 }
 0x2f1   :  { %421 = vsyncpa [#allocation5], 1 }

</bundles_post_ra>
